<compile_context>
chip_gen: v7x
topology: tpu7x:2x2x1
jax: 0.10.0
libtpu: 0.0.40
codegen_flags: <defaults>
</compile_context>

<pallas_src>
import functools

import numpy as np
import jax
import jax.numpy as jnp
from jax.experimental import pallas as pl
from jax.experimental.pallas import tpu as pltpu


MAX_COL_TILE = 4096   # lanes-axis tile; conservative for v7x (32 MiB scoped VMEM)
LANE = 128


def _round_up(n, m):
    return ((n + m - 1) // m) * m


def _col_plan(n):
    """Pick (col_tile, padded_cols) for a feature-major, column-tiled 1-D grid.

    +1 guarantees at least one sink column (dummy scatter indices route there).
    Tile is a multiple of 128 (lane-dense); for larger inputs we aim for >=2
    grid steps so both v7x TensorCores get work under 'parallel' semantics.
    """
    base = _round_up(n + 1, LANE)
    if base <= LANE:
        return base, base
    tile = min(MAX_COL_TILE, _round_up(pl.cdiv(base, 2), LANE))
    tile = max(tile, LANE)
    return tile, _round_up(base, tile)


# ----------------------------------------------------------------------------
# Pallas kernels (feature-major: arrays are (features, items), items on lanes)
# ----------------------------------------------------------------------------
def _linear_kernel_fm(x_ref, wt_ref, b_ref, o_ref, *, relu):
    y = jnp.dot(wt_ref[...], x_ref[...].astype(jnp.bfloat16),
                preferred_element_type=jnp.float32) + b_ref[...]
    if relu:
        y = jnp.maximum(y, 0.0)
    o_ref[...] = y


def linear_fm(x, wt, b, *, tile, relu=False):
    """y = [relu](W^T @ x + b), x: (din, cols), wt: (dout, din), b: (dout, 1)."""
    dout, din = wt.shape
    cols = x.shape[1]
    assert cols % tile == 0
    return pl.pallas_call(
        functools.partial(_linear_kernel_fm, relu=relu),
        grid=(cols // tile,),
        in_specs=[
            pl.BlockSpec((din, tile), lambda i: (0, i)),
            pl.BlockSpec((dout, din), lambda i: (0, 0)),
            pl.BlockSpec((dout, 1), lambda i: (0, 0)),
        ],
        out_specs=pl.BlockSpec((dout, tile), lambda i: (0, i)),
        out_shape=jax.ShapeDtypeStruct((dout, cols), jnp.float32),
        compiler_params=pltpu.CompilerParams(dimension_semantics=("parallel",)),
    )(x, wt, b)


def _fused_mlp2_kernel(*refs, act1, act2, res_mode, clamp):
    """(optional pre-add) -> Linear -> [ReLU] -> Linear -> [ReLU]
       -> (optional post residual add) -> (optional clamp); feature-major."""
    if res_mode == "none":
        x_ref, w1_ref, b1_ref, w2_ref, b2_ref, o_ref = refs
        res = None
    else:
        x_ref, r_ref, w1_ref, b1_ref, w2_ref, b2_ref, o_ref = refs
        res = r_ref[...]
    x = x_ref[...]
    if res_mode == "pre":
        x = x + res
    h = jnp.dot(w1_ref[...], x.astype(jnp.bfloat16),
                preferred_element_type=jnp.float32) + b1_ref[...]
    if act1:
        h = jnp.maximum(h, 0.0)
    y = jnp.dot(w2_ref[...], h.astype(jnp.bfloat16),
                preferred_element_type=jnp.float32) + b2_ref[...]
    if act2:
        y = jnp.maximum(y, 0.0)
    if res_mode == "post":
        y = y + res
    if clamp is not None:
        y = jnp.clip(y, clamp[0], clamp[1])
    o_ref[...] = y


def fused_mlp2(x, wt1, b1, wt2, b2, *, act1=True, act2=False, residual=None,
               res_mode="none", clamp=None, tile=None):
    """Two fused Linears, feature-major.

    Pallas when a column tile is supplied (big, padded arrays: conf-node path);
    plain XLA otherwise (tiny column counts: vn MLP, GIN MLP, output head),
    where a custom-call launch would dwarf the 32-wide matmuls.
    """
    dhid, din = wt1.shape
    dout = wt2.shape[0]
    cols = x.shape[1]
    if tile is None or cols % tile != 0:
        xx = x + residual if res_mode == "pre" else x
        h = jnp.dot(wt1, xx, preferred_element_type=jnp.float32) + b1
        if act1:
            h = jnp.maximum(h, 0.0)
        y = jnp.dot(wt2, h, preferred_element_type=jnp.float32) + b2
        if act2:
            y = jnp.maximum(y, 0.0)
        if res_mode == "post":
            y = y + residual
        if clamp is not None:
            y = jnp.clip(y, clamp[0], clamp[1])
        return y

    args = [x]
    in_specs = [pl.BlockSpec((din, tile), lambda i: (0, i))]
    if res_mode != "none":
        dres = residual.shape[0]
        args.append(residual)
        in_specs.append(pl.BlockSpec((dres, tile), lambda i: (0, i)))
    args += [wt1, b1, wt2, b2]
    in_specs += [
        pl.BlockSpec((dhid, din), lambda i: (0, 0)),
        pl.BlockSpec((dhid, 1), lambda i: (0, 0)),
        pl.BlockSpec((dout, dhid), lambda i: (0, 0)),
        pl.BlockSpec((dout, 1), lambda i: (0, 0)),
    ]
    return pl.pallas_call(
        functools.partial(_fused_mlp2_kernel, act1=act1, act2=act2,
                          res_mode=res_mode, clamp=clamp),
        grid=(cols // tile,),
        in_specs=in_specs,
        out_specs=pl.BlockSpec((dout, tile), lambda i: (0, i)),
        out_shape=jax.ShapeDtypeStruct((dout, cols), jnp.float32),
        compiler_params=pltpu.CompilerParams(dimension_semantics=("parallel",)),
    )(*args)


def _cfconv_edge_kernel(d_ref, off_ref, h_ref, w1_ref, b1_ref, w2_ref, b2_ref,
                        o_ref, *, coeff, pi_over_cutoff):
    """Gaussian smearing + filter MLP (Lin/ReLU/Lin) * cosine cutoff, then
    x_j * W message.  All feature-major: d (1,T), offsets (Gp,1), h (nf,T)."""
    d = d_ref[...]                                   # (1, T)
    diff = d - off_ref[...]                          # (1,T)-(Gp,1) -> (Gp, T)
    ea = jnp.exp(coeff * diff * diff)                # EUP
    t = jnp.dot(w1_ref[...], ea.astype(jnp.bfloat16),
                preferred_element_type=jnp.float32) + b1_ref[...]
    t = jnp.maximum(t, 0.0)
    w = jnp.dot(w2_ref[...], t.astype(jnp.bfloat16),
                preferred_element_type=jnp.float32) + b2_ref[...]
    c = 0.5 * (jnp.cos(d * pi_over_cutoff) + 1.0)    # cosine cutoff, in-kernel
    o_ref[...] = h_ref[...] * (w * c)                # message x_j * W


def cfconv_edge(dist, h_src, offsets, w1t, b1, w2t, b2, *, tile, coeff, cutoff):
    nf, gp = w1t.shape
    e = dist.shape[1]
    assert e % tile == 0
    return pl.pallas_call(
        functools.partial(_cfconv_edge_kernel, coeff=float(coeff),
                          pi_over_cutoff=float(np.pi / cutoff)),
        grid=(e // tile,),
        in_specs=[
            pl.BlockSpec((1, tile), lambda i: (0, i)),
            pl.BlockSpec((gp, 1), lambda i: (0, 0)),
            pl.BlockSpec((nf, tile), lambda i: (0, i)),
            pl.BlockSpec((nf, gp), lambda i: (0, 0)),
            pl.BlockSpec((nf, 1), lambda i: (0, 0)),
            pl.BlockSpec((nf, nf), lambda i: (0, 0)),
            pl.BlockSpec((nf, 1), lambda i: (0, 0)),
        ],
        out_specs=pl.BlockSpec((nf, tile), lambda i: (0, i)),
        out_shape=jax.ShapeDtypeStruct((nf, e), jnp.float32),
        compiler_params=pltpu.CompilerParams(dimension_semantics=("parallel",)),
    )(dist, offsets, h_src, w1t, b1, w2t, b2)


# ----------------------------------------------------------------------------
# Parameter init (deterministic, synthetic) + one-time packing/fusing
# ----------------------------------------------------------------------------
def init_linear(key, din, dout, bias=True):
    kw, kb = jax.random.split(key)
    w = jax.random.normal(kw, (din, dout), jnp.float32) / np.sqrt(din)
    b = jax.random.normal(kb, (dout,), jnp.float32) * 0.01 if bias else None
    return {"w": w, "b": b}


def init_embedding(key, vocab, dim):
    return jax.random.normal(key, (vocab, dim), jnp.float32) * 0.1


def init_bn(dim):
    # eval-mode BatchNorm1d state (running stats at their init values)
    return {
        "gamma": jnp.ones((dim,), jnp.float32),
        "beta": jnp.zeros((dim,), jnp.float32),
        "mean": jnp.zeros((dim,), jnp.float32),
        "var": jnp.ones((dim,), jnp.float32),
    }


def init_params(key, cfg):
    hid, nf, ng = cfg["hidden_dim"], cfg["num_filters"], cfg["num_gaussians"]
    keys = iter(jax.random.split(key, 128))
    params = {
        "atom_emb": [init_embedding(next(keys), v, hid) for v in cfg["atom_vocab"]],
        "layers": [],
        "vn_mlp1": init_linear(next(keys), hid, hid),
        "vn_mlp2": init_linear(next(keys), hid, hid),
        "out1": init_linear(next(keys), hid, hid),
        "out2": init_linear(next(keys), hid, cfg["num_tasks"]),
    }
    for _ in range(cfg["num_layers"]):
        lp = {
            "cf_mlp1": init_linear(next(keys), ng, nf),
            "cf_mlp2": init_linear(next(keys), nf, nf),
            "cf_lin1": init_linear(next(keys), hid, nf, bias=False),
            "cf_lin2": init_linear(next(keys), nf, hid),
            "lin": init_linear(next(keys), hid, hid),
            "gin_mlp1": init_linear(next(keys), hid, hid),
            "gin_bn": init_bn(hid),
            "gin_mlp2": init_linear(next(keys), hid, hid),
            "gin_eps": jnp.zeros((), jnp.float32),
            "bond_emb": [init_embedding(next(keys), v, hid) for v in cfg["bond_vocab"]],
            "bn": init_bn(hid),
        }
        params["layers"].append(lp)
    return params


def _fold_bn_into_linear(w, b, bn, eps=1e-5):
    """BN(x @ w + b)  ==  x @ (w*scale) + ((b-mean)*scale + beta)."""
    scale = bn["gamma"] / jnp.sqrt(bn["var"] + eps)
    b0 = b if b is not None else jnp.zeros((w.shape[1],), jnp.float32)
    return w * scale[None, :], (b0 - bn["mean"]) * scale + bn["beta"]


def prepare_params(params, cfg, ng_pad):
    """One-time packing: fold eval BN into Linears, zero-pad the Gaussian-K dim,
    transpose weights for the feature-major (W^T @ X) layout, cast to bf16,
    reshape biases to (dout, 1) f32, transpose embedding tables to (hid, vocab)."""
    hid, nf, ng = cfg["hidden_dim"], cfg["num_filters"], cfg["num_gaussians"]

    def wt_pack(w):                       # (din, dout) -> (dout, din) bf16
        return jnp.asarray(w).T.astype(jnp.bfloat16)

    def b_pack(b, dout):
        if b is None:
            b = jnp.zeros((dout,), jnp.float32)
        return jnp.reshape(b, (dout, 1)).astype(jnp.float32)

    pp = {
        "atom_emb_t": [e.T.astype(jnp.float32) for e in params["atom_emb"]],
        "vn_mlp1": {"wt": wt_pack(params["vn_mlp1"]["w"]), "b": b_pack(params["vn_mlp1"]["b"], hid)},
        "vn_mlp2": {"wt": wt_pack(params["vn_mlp2"]["w"]), "b": b_pack(params["vn_mlp2"]["b"], hid)},
        "out1": {"wt": wt_pack(params["out1"]["w"]), "b": b_pack(params["out1"]["b"], hid)},
        "out2": {"wt": wt_pack(params["out2"]["w"]), "b": b_pack(params["out2"]["b"], cfg["num_tasks"])},
        "layers": [],
    }
    for lp in params["layers"]:
        # pad the Gaussian (K) dimension with ZERO weight rows -> exact numerics
        w1_pad = jnp.zeros((ng_pad, nf), jnp.float32).at[:ng, :].set(lp["cf_mlp1"]["w"])
        gin_w1, gin_b1 = _fold_bn_into_linear(lp["gin_mlp1"]["w"], lp["gin_mlp1"]["b"], lp["gin_bn"])
        gin_w2, gin_b2 = _fold_bn_into_linear(lp["gin_mlp2"]["w"], lp["gin_mlp2"]["b"], lp["bn"])
        pp["layers"].append({
            "cf_mlp1": {"wt": wt_pack(w1_pad), "b": b_pack(lp["cf_mlp1"]["b"], nf)},
            "cf_mlp2": {"wt": wt_pack(lp["cf_mlp2"]["w"]), "b": b_pack(lp["cf_mlp2"]["b"], nf)},
            "cf_lin1": {"wt": wt_pack(lp["cf_lin1"]["w"]), "b": b_pack(None, nf)},
            "cf_lin2": {"wt": wt_pack(lp["cf_lin2"]["w"]), "b": b_pack(lp["cf_lin2"]["b"], hid)},
            "lin": {"wt": wt_pack(lp["lin"]["w"]), "b": b_pack(lp["lin"]["b"], hid)},
            "gin_mlp1": {"wt": wt_pack(gin_w1), "b": b_pack(gin_b1, hid)},
            "gin_mlp2": {"wt": wt_pack(gin_w2), "b": b_pack(gin_b2, hid)},
            "gin_eps": lp["gin_eps"],
            "bond_emb_t": [e.T.astype(jnp.float32) for e in lp["bond_emb"]],
        })
    return pp


# ----------------------------------------------------------------------------
# Model (Pallas kernels on the big conf-node/edge arrays, XLA for graph glue)
# ----------------------------------------------------------------------------
def dss_layer_apply(lp, x, cnb_pad, dist, src_pad, dst_pad, offsets, coeff, cutoff,
                    edge_index_graph, edge_attr_graph, n_topo, node_tile, edge_tile):
    hid, n_conf_pad = x.shape
    nf = lp["cf_lin1"]["wt"].shape[0]

    # --- conformer (3D) branch: CFConv -> relu -> lin (+ residual), Pallas ---
    h = linear_fm(x, lp["cf_lin1"]["wt"], lp["cf_lin1"]["b"], tile=node_tile)     # (nf, Np)
    h_src = h[:, src_pad]                                                          # gather (XLA)
    msg = cfconv_edge(dist, h_src, offsets,
                      lp["cf_mlp1"]["wt"], lp["cf_mlp1"]["b"],
                      lp["cf_mlp2"]["wt"], lp["cf_mlp2"]["b"],
                      tile=edge_tile, coeff=coeff, cutoff=cutoff)                  # (nf, Ep)
    # TODO(synk): segmented reduction stays in XLA; dummy edges route to the sink
    #             column (dst = n_conf < n_conf_pad) so padded results are exact.
    agg = jnp.zeros((nf, n_conf_pad), jnp.float32).at[:, dst_pad].add(msg)
    out = fused_mlp2(agg, lp["cf_lin2"]["wt"], lp["cf_lin2"]["b"],
                     lp["lin"]["wt"], lp["lin"]["b"],
                     act1=True, act2=False, residual=x, res_mode="post",
                     tile=node_tile)                                               # (hid, Np)

    # --- topology (2D) branch: scatter-max -> GIN (BN folded) -> broadcast ---
    # Small column count (n_topo) -> plain XLA per the perf review.
    neg = jnp.finfo(jnp.float32).min
    x_agg = jnp.full((hid, n_topo + 1), neg, jnp.float32).at[:, cnb_pad].max(x)    # +1 sink col
    edge_emb = sum(et[:, edge_attr_graph[:, i]] for i, et in enumerate(lp["bond_emb_t"]))
    gsrc, gdst = edge_index_graph[0], edge_index_graph[1]
    gmsg = jnp.maximum(x_agg[:, gsrc] + edge_emb, 0.0)                             # GIN message
    gagg = jnp.zeros((hid, n_topo + 1), jnp.float32).at[:, gdst].add(gmsg)
    h_pre = (1.0 + lp["gin_eps"]) * x_agg + gagg
    x_agg = fused_mlp2(h_pre, lp["gin_mlp1"]["wt"], lp["gin_mlp1"]["b"],
                       lp["gin_mlp2"]["wt"], lp["gin_mlp2"]["b"],
                       act1=True, act2=False, tile=None)                           # XLA path
    out = out + x_agg[:, cnb_pad]
    return out


def make_forward(cfg, num_mols):
    hid = cfg["hidden_dim"]
    cutoff = float(cfg["cutoff"])
    num_layers = cfg["num_layers"]
    ng = cfg["num_gaussians"]
    ng_pad = _round_up(ng, 64)                               # lane-aligned K (50 -> 64)
    offs = np.linspace(0.0, cutoff, ng).astype(np.float32)
    coeff = -0.5 / float(offs[1] - offs[0]) ** 2
    off_pad = np.full((ng_pad, 1), cutoff, np.float32)       # dummy offsets; weights are 0
    off_pad[:ng, 0] = offs
    offsets = jnp.asarray(off_pad)

    @jax.jit
    def forward(pp, atom_x, pos, conf_node_batch, pos_batch, conf_batch,
                edge_index_conf, edge_index_graph, edge_attr_graph):
        n_topo = atom_x.shape[0]
        num_confs = conf_batch.shape[0]
        n_conf = conf_node_batch.shape[0]
        e_conf = edge_index_conf.shape[1]
        node_tile, n_conf_pad = _col_plan(n_conf)            # pad ONCE; >=1 sink col
        edge_tile, e_pad = _col_plan(e_conf)

        # padded index arrays (dummy entries route to sink segments/columns)
        cnb_pad = jnp.pad(conf_node_batch, (0, n_conf_pad - n_conf), constant_values=n_topo)
        pb_pad = jnp.pad(pos_batch, (0, n_conf_pad - n_conf), constant_values=num_confs)
        src, dst = edge_index_conf[0], edge_index_conf[1]
        src_pad = jnp.pad(src, (0, e_pad - e_conf), constant_values=0)
        dst_pad = jnp.pad(dst, (0, e_pad - e_conf), constant_values=n_conf)  # sink column

        # AtomEncoder (sum of per-feature embeddings), feature-major, + sink col
        x_topo = sum(et[:, atom_x[:, i]] for i, et in enumerate(pp["atom_emb_t"]))
        x_topo = jnp.pad(x_topo, ((0, 0), (0, 1)))           # (hid, n_topo+1)
        x = x_topo[:, cnb_pad]                               # (hid, n_conf_pad)

        # radius-graph edge distances; cosine cutoff + Gaussian smearing are
        # computed inside the per-layer CFConv edge kernel
        dvec = pos[src] - pos[dst]
        edge_weight = jnp.sqrt(jnp.sum(dvec * dvec, axis=-1))
        dist = jnp.pad(edge_weight[None, :], ((0, 0), (0, e_pad - e_conf)))  # (1, e_pad)

        # virtual node embedding (constant-initialised to 0), + sink column
        vn = jnp.zeros((hid, num_confs + 1), jnp.float32)

        for i, lp in enumerate(pp["layers"]):
            x = x + vn[:, pb_pad]
            if i < num_layers - 1:
                pooled = jnp.zeros((hid, num_confs + 1), jnp.float32).at[:, pb_pad].add(x)
                # tiny column count -> XLA path of fused_mlp2
                vn = fused_mlp2(pooled + vn, pp["vn_mlp1"]["wt"], pp["vn_mlp1"]["b"],
                                pp["vn_mlp2"]["wt"], pp["vn_mlp2"]["b"],
                                act1=True, act2=True, tile=None)
            x = dss_layer_apply(lp, x, cnb_pad, dist, src_pad, dst_pad, offsets,
                                coeff, cutoff, edge_index_graph, edge_attr_graph,
                                n_topo, node_tile, edge_tile)
            x = jnp.maximum(x, 0.0)

        # readout: max over conformer nodes, then max over conformers per molecule
        neg = jnp.finfo(jnp.float32).min
        x_conf = jnp.full((hid, num_confs + 1), neg, jnp.float32).at[:, pb_pad].max(x)
        x_conf = x_conf[:, :num_confs]
        x_mol = jnp.full((hid, num_mols), neg, jnp.float32).at[:, conf_batch].max(x_conf)
        # out1 -> relu -> out2 -> eval-mode clamp (tiny rows -> XLA path)
        y = fused_mlp2(x_mol, pp["out1"]["wt"], pp["out1"]["b"],
                       pp["out2"]["wt"], pp["out2"]["b"],
                       act1=True, act2=False, clamp=(0.0, 50.0), tile=None)
        return y.T                                           # (num_mols, num_tasks)

    return forward, ng_pad


# ----------------------------------------------------------------------------
# Example run
# ----------------------------------------------------------------------------
if __name__ == "__main__":
    cfg = dict(hidden_dim=32, num_filters=32, num_gaussians=50, cutoff=5.0,
               num_layers=2, num_tasks=1, atom_vocab=(5, 3), bond_vocab=(4, 3))

    key = jax.random.PRNGKey(0)
    k_data, k_param = jax.random.split(key)
    ka, kp, kb = jax.random.split(k_data, 3)

    num_mols = 2
    confs_per_mol = 2
    nodes_per_mol = 8
    n_topo = num_mols * nodes_per_mol            # 16 topology nodes
    num_confs = num_mols * confs_per_mol         # 4 conformers total
    n_conf_nodes = num_confs * nodes_per_mol     # 32 conformer nodes

    # categorical atom features on the topology graph
    atom_x = jnp.stack([
        jax.random.randint(ka, (n_topo,), 0, cfg["atom_vocab"][0]),
        jax.random.randint(jax.random.fold_in(ka, 1), (n_topo,), 0, cfg["atom_vocab"][1]),
    ], axis=1).astype(jnp.int32)

    # bookkeeping (equivalent of get_conf_node_idx / pos_batch / get_mol_idx)
    conf_node_batch, pos_batch, conf_batch = [], [], []
    conf_id = 0
    for m in range(num_mols):
        for _ in range(confs_per_mol):
            conf_node_batch.extend(range(m * nodes_per_mol, (m + 1) * nodes_per_mol))
            pos_batch.extend([conf_id] * nodes_per_mol)
            conf_batch.append(m)
            conf_id += 1
    conf_node_batch = jnp.asarray(conf_node_batch, jnp.int32)
    pos_batch = jnp.asarray(pos_batch, jnp.int32)
    conf_batch = jnp.asarray(conf_batch, jnp.int32)

    # 3D coordinates of conformer nodes
    pos = jax.random.normal(kp, (n_conf_nodes, 3), jnp.float32) * 1.5

    # radius_graph(pos, r=cutoff, batch=pos_batch) — built with numpy (glue, static edge list)
    pos_np = np.asarray(pos)
    pb_np = np.asarray(pos_batch)
    dmat = np.linalg.norm(pos_np[:, None, :] - pos_np[None, :, :], axis=-1)
    mask = (dmat < cfg["cutoff"]) & (pb_np[:, None] == pb_np[None, :]) \
           & (~np.eye(n_conf_nodes, dtype=bool))
    e_src, e_dst = np.nonzero(mask)
    edge_index_conf = jnp.asarray(np.stack([e_src, e_dst]), jnp.int32)

    # topology bond graph: ring per molecule, both directions; categorical bond features
    eg_src, eg_dst = [], []
    for m in range(num_mols):
        base = m * nodes_per_mol
        for i in range(nodes_per_mol):
            j = (i + 1) % nodes_per_mol
            eg_src += [base + i, base + j]
            eg_dst += [base + j, base + i]
    edge_index_graph = jnp.asarray(np.stack([eg_src, eg_dst]), jnp.int32)
    n_bond_edges = edge_index_graph.shape[1]
    edge_attr_graph = jnp.stack([
        jax.random.randint(kb, (n_bond_edges,), 0, cfg["bond_vocab"][0]),
        jax.random.randint(jax.random.fold_in(kb, 1), (n_bond_edges,), 0, cfg["bond_vocab"][1]),
    ], axis=1).astype(jnp.int32)

    params = init_params(k_param, cfg)
    forward, ng_pad = make_forward(cfg, num_mols)
    packed = prepare_params(params, cfg, ng_pad)   # fold BN, pad K, transpose, bf16 — once

    out = forward(packed, atom_x, pos, conf_node_batch, pos_batch, conf_batch,
                  edge_index_conf, edge_index_graph, edge_attr_graph)
    out = jax.block_until_ready(out)
    assert out.shape == (num_mols, cfg["num_tasks"])
    assert bool(jnp.all(jnp.isfinite(out)))
    print("KERNEL_OK")
</pallas_src>

<mosaic_0001>
module attributes {stable_mosaic.version = 11 : i64} {
  func.func @_linear_kernel_fm(%arg0: i32, %arg1: memref<32x128xf32, #tpu.memory_space<vmem>>, %arg2: memref<32x32xbf16, #tpu.memory_space<vmem>>, %arg3: memref<32x1xf32, #tpu.memory_space<vmem>>, %arg4: memref<32x128xf32, #tpu.memory_space<vmem>>) attributes {dimension_semantics = [#tpu.dimension_semantics<parallel>], iteration_bounds = array<i64: 1>, scalar_prefetch = 0 : i64, scratch_operands = 0 : i64, tpu.core_type = #tpu.core_type<tc>, window_params = [{transform_indices = @transform_0, window_bounds = array<i64: 32, 128>}, {pipeline_mode = #tpu.pipeline_mode<synchronous>, transform_indices = @transform_1, window_bounds = array<i64: 32, 32>}, {pipeline_mode = #tpu.pipeline_mode<synchronous>, transform_indices = @transform_2, window_bounds = array<i64: 32, 1>}, {transform_indices = @transform_3, window_bounds = array<i64: 32, 128>}]} {
    %c0 = arith.constant 0 : index
    %c0_0 = arith.constant 0 : index
    %0 = vector.load %arg2[%c0, %c0_0] : memref<32x32xbf16, #tpu.memory_space<vmem>>, vector<32x32xbf16>
    %c0_1 = arith.constant 0 : index
    %c0_2 = arith.constant 0 : index
    %1 = vector.load %arg1[%c0_1, %c0_2] : memref<32x128xf32, #tpu.memory_space<vmem>>, vector<32x128xf32>
    %2 = arith.truncf %1 : vector<32x128xf32> to vector<32x128xbf16>
    %cst = arith.constant dense<0.000000e+00> : vector<32x128xf32>
    %3 = tpu.matmul %0, %2, %cst {dimension_numbers = #tpu.dot_dimension_numbers<[1], [0], [0], [1], [0, 0, 1, 1], [], []>} : vector<32x32xbf16>, vector<32x128xbf16>, vector<32x128xf32> -> vector<32x128xf32>
    %c0_3 = arith.constant 0 : index
    %c0_4 = arith.constant 0 : index
    %4 = vector.load %arg3[%c0_3, %c0_4] : memref<32x1xf32, #tpu.memory_space<vmem>>, vector<32x1xf32>
    %5 = vector.broadcast %4 : vector<32x1xf32> to vector<32x128xf32>
    %6 = arith.addf %3, %5 : vector<32x128xf32>
    %c0_5 = arith.constant 0 : index
    %c0_6 = arith.constant 0 : index
    %7 = vector.load %arg4[%c0_5, %c0_6] : memref<32x128xf32, #tpu.memory_space<vmem>>, vector<32x128xf32>
    tpu.vector_store %arg4[%c0_5, %c0_6], %6 {strides = array<i32>} : memref<32x128xf32, #tpu.memory_space<vmem>>, vector<32x128xf32>,
    return
  }
  func.func @transform_0(%arg0: i32) -> (i32, i32) {
    %c0_i32 = arith.constant 0 : i32
    %c0_i32_0 = arith.constant 0 : i32
    return %c0_i32, %arg0 : i32, i32
  }
  func.func @transform_1(%arg0: i32) -> (i32, i32) {
    %c0_i32 = arith.constant 0 : i32
    %c0_i32_0 = arith.constant 0 : i32
    %c0_i32_1 = arith.constant 0 : i32
    return %c0_i32, %c0_i32_0 : i32, i32
  }
  func.func @transform_2(%arg0: i32) -> (i32, i32) {
    %c0_i32 = arith.constant 0 : i32
    %c0_i32_0 = arith.constant 0 : i32
    %c0_i32_1 = arith.constant 0 : i32
    return %c0_i32, %c0_i32_0 : i32, i32
  }
  func.func @transform_3(%arg0: i32) -> (i32, i32) {
    %c0_i32 = arith.constant 0 : i32
    %c0_i32_0 = arith.constant 0 : i32
    return %c0_i32, %arg0 : i32, i32
  }
}

module attributes {stable_mosaic.version = 11 : i64} {
  func.func @_cfconv_edge_kernel(%arg0: i32, %arg1: memref<1x128xf32, #tpu.memory_space<vmem>>, %arg2: memref<64x1xf32, #tpu.memory_space<vmem>>, %arg3: memref<32x128xf32, #tpu.memory_space<vmem>>, %arg4: memref<32x64xbf16, #tpu.memory_space<vmem>>, %arg5: memref<32x1xf32, #tpu.memory_space<vmem>>, %arg6: memref<32x32xbf16, #tpu.memory_space<vmem>>, %arg7: memref<32x1xf32, #tpu.memory_space<vmem>>, %arg8: memref<32x128xf32, #tpu.memory_space<vmem>>) attributes {dimension_semantics = [#tpu.dimension_semantics<parallel>], iteration_bounds = array<i64: 2>, scalar_prefetch = 0 : i64, scratch_operands = 0 : i64, tpu.core_type = #tpu.core_type<tc>, window_params = [{transform_indices = @transform_0, window_bounds = array<i64: 1, 128>}, {pipeline_mode = #tpu.pipeline_mode<synchronous>, transform_indices = @transform_1, window_bounds = array<i64: 64, 1>}, {transform_indices = @transform_2, window_bounds = array<i64: 32, 128>}, {pipeline_mode = #tpu.pipeline_mode<synchronous>, transform_indices = @transform_3, window_bounds = array<i64: 32, 64>}, {pipeline_mode = #tpu.pipeline_mode<synchronous>, transform_indices = @transform_4, window_bounds = array<i64: 32, 1>}, {pipeline_mode = #tpu.pipeline_mode<synchronous>, transform_indices = @transform_5, window_bounds = array<i64: 32, 32>}, {pipeline_mode = #tpu.pipeline_mode<synchronous>, transform_indices = @transform_6, window_bounds = array<i64: 32, 1>}, {transform_indices = @transform_7, window_bounds = array<i64: 32, 128>}]} {
    %c0 = arith.constant 0 : index
    %c0_0 = arith.constant 0 : index
    %0 = vector.load %arg1[%c0, %c0_0] : memref<1x128xf32, #tpu.memory_space<vmem>>, vector<1x128xf32>
    %c0_1 = arith.constant 0 : index
    %c0_2 = arith.constant 0 : index
    %1 = vector.load %arg2[%c0_1, %c0_2] : memref<64x1xf32, #tpu.memory_space<vmem>>, vector<64x1xf32>
    %2 = vector.broadcast %0 : vector<1x128xf32> to vector<64x128xf32>
    %3 = vector.broadcast %1 : vector<64x1xf32> to vector<64x128xf32>
    %4 = arith.subf %2, %3 : vector<64x128xf32>
    %cst = arith.constant -48.0199966 : f32
    %5 = vector.broadcast %cst : f32 to vector<64x128xf32>
    %6 = arith.mulf %5, %4 : vector<64x128xf32>
    %7 = arith.mulf %6, %4 : vector<64x128xf32>
    %8 = math.exp %7 : vector<64x128xf32>
    %c0_3 = arith.constant 0 : index
    %c0_4 = arith.constant 0 : index
    %9 = vector.load %arg4[%c0_3, %c0_4] : memref<32x64xbf16, #tpu.memory_space<vmem>>, vector<32x64xbf16>
    %10 = arith.truncf %8 : vector<64x128xf32> to vector<64x128xbf16>
    %cst_5 = arith.constant dense<0.000000e+00> : vector<32x128xf32>
    %11 = tpu.matmul %9, %10, %cst_5 {dimension_numbers = #tpu.dot_dimension_numbers<[1], [0], [0], [1], [0, 0, 1, 1], [], []>} : vector<32x64xbf16>, vector<64x128xbf16>, vector<32x128xf32> -> vector<32x128xf32>
    %c0_6 = arith.constant 0 : index
    %c0_7 = arith.constant 0 : index
    %12 = vector.load %arg5[%c0_6, %c0_7] : memref<32x1xf32, #tpu.memory_space<vmem>>, vector<32x1xf32>
    %13 = vector.broadcast %12 : vector<32x1xf32> to vector<32x128xf32>
    %14 = arith.addf %11, %13 : vector<32x128xf32>
    %cst_8 = arith.constant 0.000000e+00 : f32
    %15 = vector.broadcast %cst_8 : f32 to vector<32x128xf32>
    %16 = arith.maximumf %14, %15 : vector<32x128xf32>
    %c0_9 = arith.constant 0 : index
    %c0_10 = arith.constant 0 : index
    %17 = vector.load %arg6[%c0_9, %c0_10] : memref<32x32xbf16, #tpu.memory_space<vmem>>, vector<32x32xbf16>
    %18 = arith.truncf %16 : vector<32x128xf32> to vector<32x128xbf16>
    %cst_11 = arith.constant dense<0.000000e+00> : vector<32x128xf32>
    %19 = tpu.matmul %17, %18, %cst_11 {dimension_numbers = #tpu.dot_dimension_numbers<[1], [0], [0], [1], [0, 0, 1, 1], [], []>} : vector<32x32xbf16>, vector<32x128xbf16>, vector<32x128xf32> -> vector<32x128xf32>
    %c0_12 = arith.constant 0 : index
    %c0_13 = arith.constant 0 : index
    %20 = vector.load %arg7[%c0_12, %c0_13] : memref<32x1xf32, #tpu.memory_space<vmem>>, vector<32x1xf32>
    %21 = vector.broadcast %20 : vector<32x1xf32> to vector<32x128xf32>
    %22 = arith.addf %19, %21 : vector<32x128xf32>
    %cst_14 = arith.constant 0.628318548 : f32
    %23 = vector.broadcast %cst_14 : f32 to vector<1x128xf32>
    %24 = arith.mulf %0, %23 : vector<1x128xf32>
    %25 = math.cos %24 : vector<1x128xf32>
    %cst_15 = arith.constant 1.000000e+00 : f32
    %26 = vector.broadcast %cst_15 : f32 to vector<1x128xf32>
    %27 = arith.addf %25, %26 : vector<1x128xf32>
    %cst_16 = arith.constant 5.000000e-01 : f32
    %28 = vector.broadcast %cst_16 : f32 to vector<1x128xf32>
    %29 = arith.mulf %28, %27 : vector<1x128xf32>
    %c0_17 = arith.constant 0 : index
    %c0_18 = arith.constant 0 : index
    %30 = vector.load %arg3[%c0_17, %c0_18] : memref<32x128xf32, #tpu.memory_space<vmem>>, vector<32x128xf32>
    %31 = vector.broadcast %29 : vector<1x128xf32> to vector<32x128xf32>
    %32 = arith.mulf %22, %31 : vector<32x128xf32>
    %33 = arith.mulf %30, %32 : vector<32x128xf32>
    %c0_19 = arith.constant 0 : index
    %c0_20 = arith.constant 0 : index
    %34 = vector.load %arg8[%c0_19, %c0_20] : memref<32x128xf32, #tpu.memory_space<vmem>>, vector<32x128xf32>
    tpu.vector_store %arg8[%c0_19, %c0_20], %33 {strides = array<i32>} : memref<32x128xf32, #tpu.memory_space<vmem>>, vector<32x128xf32>,
    return
  }
  func.func @transform_0(%arg0: i32) -> (i32, i32) {
    %c0_i32 = arith.constant 0 : i32
    %c0_i32_0 = arith.constant 0 : i32
    return %c0_i32, %arg0 : i32, i32
  }
  func.func @transform_1(%arg0: i32) -> (i32, i32) {
    %c0_i32 = arith.constant 0 : i32
    %c0_i32_0 = arith.constant 0 : i32
    %c0_i32_1 = arith.constant 0 : i32
    return %c0_i32, %c0_i32_0 : i32, i32
  }
  func.func @transform_2(%arg0: i32) -> (i32, i32) {
    %c0_i32 = arith.constant 0 : i32
    %c0_i32_0 = arith.constant 0 : i32
    return %c0_i32, %arg0 : i32, i32
  }
  func.func @transform_3(%arg0: i32) -> (i32, i32) {
    %c0_i32 = arith.constant 0 : i32
    %c0_i32_0 = arith.constant 0 : i32
    %c0_i32_1 = arith.constant 0 : i32
    return %c0_i32, %c0_i32_0 : i32, i32
  }
  func.func @transform_4(%arg0: i32) -> (i32, i32) {
    %c0_i32 = arith.constant 0 : i32
    %c0_i32_0 = arith.constant 0 : i32
    %c0_i32_1 = arith.constant 0 : i32
    return %c0_i32, %c0_i32_0 : i32, i32
  }
  func.func @transform_5(%arg0: i32) -> (i32, i32) {
    %c0_i32 = arith.constant 0 : i32
    %c0_i32_0 = arith.constant 0 : i32
    %c0_i32_1 = arith.constant 0 : i32
    return %c0_i32, %c0_i32_0 : i32, i32
  }
  func.func @transform_6(%arg0: i32) -> (i32, i32) {
    %c0_i32 = arith.constant 0 : i32
    %c0_i32_0 = arith.constant 0 : i32
    %c0_i32_1 = arith.constant 0 : i32
    return %c0_i32, %c0_i32_0 : i32, i32
  }
  func.func @transform_7(%arg0: i32) -> (i32, i32) {
    %c0_i32 = arith.constant 0 : i32
    %c0_i32_0 = arith.constant 0 : i32
    return %c0_i32, %arg0 : i32, i32
  }
}

module attributes {stable_mosaic.version = 11 : i64} {
  func.func @_fused_mlp2_kernel(%arg0: i32, %arg1: memref<32x128xf32, #tpu.memory_space<vmem>>, %arg2: memref<32x128xf32, #tpu.memory_space<vmem>>, %arg3: memref<32x32xbf16, #tpu.memory_space<vmem>>, %arg4: memref<32x1xf32, #tpu.memory_space<vmem>>, %arg5: memref<32x32xbf16, #tpu.memory_space<vmem>>, %arg6: memref<32x1xf32, #tpu.memory_space<vmem>>, %arg7: memref<32x128xf32, #tpu.memory_space<vmem>>) attributes {dimension_semantics = [#tpu.dimension_semantics<parallel>], iteration_bounds = array<i64: 1>, scalar_prefetch = 0 : i64, scratch_operands = 0 : i64, tpu.core_type = #tpu.core_type<tc>, window_params = [{transform_indices = @transform_0, window_bounds = array<i64: 32, 128>}, {transform_indices = @transform_1, window_bounds = array<i64: 32, 128>}, {pipeline_mode = #tpu.pipeline_mode<synchronous>, transform_indices = @transform_2, window_bounds = array<i64: 32, 32>}, {pipeline_mode = #tpu.pipeline_mode<synchronous>, transform_indices = @transform_3, window_bounds = array<i64: 32, 1>}, {pipeline_mode = #tpu.pipeline_mode<synchronous>, transform_indices = @transform_4, window_bounds = array<i64: 32, 32>}, {pipeline_mode = #tpu.pipeline_mode<synchronous>, transform_indices = @transform_5, window_bounds = array<i64: 32, 1>}, {transform_indices = @transform_6, window_bounds = array<i64: 32, 128>}]} {
    %c0 = arith.constant 0 : index
    %c0_0 = arith.constant 0 : index
    %0 = vector.load %arg2[%c0, %c0_0] : memref<32x128xf32, #tpu.memory_space<vmem>>, vector<32x128xf32>
    %c0_1 = arith.constant 0 : index
    %c0_2 = arith.constant 0 : index
    %1 = vector.load %arg1[%c0_1, %c0_2] : memref<32x128xf32, #tpu.memory_space<vmem>>, vector<32x128xf32>
    %c0_3 = arith.constant 0 : index
    %c0_4 = arith.constant 0 : index
    %2 = vector.load %arg3[%c0_3, %c0_4] : memref<32x32xbf16, #tpu.memory_space<vmem>>, vector<32x32xbf16>
    %3 = arith.truncf %1 : vector<32x128xf32> to vector<32x128xbf16>
    %cst = arith.constant dense<0.000000e+00> : vector<32x128xf32>
    %4 = tpu.matmul %2, %3, %cst {dimension_numbers = #tpu.dot_dimension_numbers<[1], [0], [0], [1], [0, 0, 1, 1], [], []>} : vector<32x32xbf16>, vector<32x128xbf16>, vector<32x128xf32> -> vector<32x128xf32>
    %c0_5 = arith.constant 0 : index
    %c0_6 = arith.constant 0 : index
    %5 = vector.load %arg4[%c0_5, %c0_6] : memref<32x1xf32, #tpu.memory_space<vmem>>, vector<32x1xf32>
    %6 = vector.broadcast %5 : vector<32x1xf32> to vector<32x128xf32>
    %7 = arith.addf %4, %6 : vector<32x128xf32>
    %cst_7 = arith.constant 0.000000e+00 : f32
    %8 = vector.broadcast %cst_7 : f32 to vector<32x128xf32>
    %9 = arith.maximumf %7, %8 : vector<32x128xf32>
    %c0_8 = arith.constant 0 : index
    %c0_9 = arith.constant 0 : index
    %10 = vector.load %arg5[%c0_8, %c0_9] : memref<32x32xbf16, #tpu.memory_space<vmem>>, vector<32x32xbf16>
    %11 = arith.truncf %9 : vector<32x128xf32> to vector<32x128xbf16>
    %cst_10 = arith.constant dense<0.000000e+00> : vector<32x128xf32>
    %12 = tpu.matmul %10, %11, %cst_10 {dimension_numbers = #tpu.dot_dimension_numbers<[1], [0], [0], [1], [0, 0, 1, 1], [], []>} : vector<32x32xbf16>, vector<32x128xbf16>, vector<32x128xf32> -> vector<32x128xf32>
    %c0_11 = arith.constant 0 : index
    %c0_12 = arith.constant 0 : index
    %13 = vector.load %arg6[%c0_11, %c0_12] : memref<32x1xf32, #tpu.memory_space<vmem>>, vector<32x1xf32>
    %14 = vector.broadcast %13 : vector<32x1xf32> to vector<32x128xf32>
    %15 = arith.addf %12, %14 : vector<32x128xf32>
    %16 = arith.addf %15, %0 : vector<32x128xf32>
    %c0_13 = arith.constant 0 : index
    %c0_14 = arith.constant 0 : index
    %17 = vector.load %arg7[%c0_13, %c0_14] : memref<32x128xf32, #tpu.memory_space<vmem>>, vector<32x128xf32>
    tpu.vector_store %arg7[%c0_13, %c0_14], %16 {strides = array<i32>} : memref<32x128xf32, #tpu.memory_space<vmem>>, vector<32x128xf32>,
    return
  }
  func.func @transform_0(%arg0: i32) -> (i32, i32) {
    %c0_i32 = arith.constant 0 : i32
    %c0_i32_0 = arith.constant 0 : i32
    return %c0_i32, %arg0 : i32, i32
  }
  func.func @transform_1(%arg0: i32) -> (i32, i32) {
    %c0_i32 = arith.constant 0 : i32
    %c0_i32_0 = arith.constant 0 : i32
    return %c0_i32, %arg0 : i32, i32
  }
  func.func @transform_2(%arg0: i32) -> (i32, i32) {
    %c0_i32 = arith.constant 0 : i32
    %c0_i32_0 = arith.constant 0 : i32
    %c0_i32_1 = arith.constant 0 : i32
    return %c0_i32, %c0_i32_0 : i32, i32
  }
  func.func @transform_3(%arg0: i32) -> (i32, i32) {
    %c0_i32 = arith.constant 0 : i32
    %c0_i32_0 = arith.constant 0 : i32
    %c0_i32_1 = arith.constant 0 : i32
    return %c0_i32, %c0_i32_0 : i32, i32
  }
  func.func @transform_4(%arg0: i32) -> (i32, i32) {
    %c0_i32 = arith.constant 0 : i32
    %c0_i32_0 = arith.constant 0 : i32
    %c0_i32_1 = arith.constant 0 : i32
    return %c0_i32, %c0_i32_0 : i32, i32
  }
  func.func @transform_5(%arg0: i32) -> (i32, i32) {
    %c0_i32 = arith.constant 0 : i32
    %c0_i32_0 = arith.constant 0 : i32
    %c0_i32_1 = arith.constant 0 : i32
    return %c0_i32, %c0_i32_0 : i32, i32
  }
  func.func @transform_6(%arg0: i32) -> (i32, i32) {
    %c0_i32 = arith.constant 0 : i32
    %c0_i32_0 = arith.constant 0 : i32
    return %c0_i32, %arg0 : i32, i32
  }
}

</mosaic_0001>

<bundles_post_ra>
// kernel: forward.6
= control target key start
LH: loop header
LB: loop body
LE: loop exit
PB: predicated region body
PF: predicated region fallthrough
CT: control target
= control target key end

     0   :  { %v144_v3 = vmov 0   ;;  %vm59_vm0 = vcmask 261120   ;;  %s209_s0 = inlined_call_operand.vmem [shape: f32[32,128], index: 0, kind: input, shape index: {}]   ;;  %s210_s1 = inlined_call_operand.vmem [shape: bf16[32,32], index: 1, kind: input, shape index: {}]   ;;  %s211_s2 = inlined_call_operand.vmem [shape: f32[32,1], index: 2, kind: input, shape index: {}]   ;;  %s212_s3 = inlined_call_operand.vmem [shape: f32[32,128], index: 3, kind: output, shape index: {}]  }
   0x1   :  { %v19_v0 = vld [vmem:[%s209_s0] sm:$0xff]  ;;  %v20_v1 = vld [vmem:[%s209_s0 + $0x8] sm:$0xff]  ;;  %v21_v2 = vld [vmem:[%s209_s0 + $0x10] sm:$0xff]  ;;  %141 = vset.pattern.permute.xlu1 %v144_v3  ;;  %140 = vset.pattern.permute.xlu0 %v144_v3 }
   0x2   :  { %v23_v4 = vpack.c.bf16 %v20_v1, %v19_v0  ;;  %v22_v5 = vld [vmem:[%s209_s0 + $0x18] sm:$0xff]  ;;  %v142_v7 = vld [vmem:[%s210_s1] sm:$0xff]   ;;  %v27_v8 = vld [vmem:[%s211_s2 + $0x10] sm:$0xff] }
   0x3   :  { %v24_v6 = vpack.c.bf16 %v22_v5, %v21_v2  ;;  %v25_v9 = vld [vmem:[%s211_s2] sm:$0xff]  ;;  %135 = vmatprep.mubr.msk.bf16.mxu0 %vm59_vm0, %v142_v7  ;;  %41 = vperm.xlu1 %141, %v27_v8   ;;  %v28_v10 = vld [vmem:[%s211_s2 + $0x18] sm:$0xff]  ;;  %v143_v11 = vld [vmem:[%s210_s1 + $0x8] sm:$0xff]  }
   0x4   :  { %131 = vmatprep.subr.bf16.mxu0 %v23_v4  ;;  %31 = vperm.xlu0 %140, %v25_v9   ;;  %v26_v12 = vld [vmem:[%s211_s2 + $0x8] sm:$0xff] }
   0x5   :  { %132 = vmatpush3.bf16.msra.mxu0 %v23_v4 }
   0x6   :  { %133 = vmatprep.subr.bf16.mxu0 %v24_v6 }
   0x7   :  { %46 = vperm.xlu1 %141, %v28_v10  }
   0x8   :  { %36 = vperm.xlu0 %140, %v26_v12  }
   0x9   :  { %134 = vmatpush3.bf16.msra.mxu0 %v24_v6 }
   0xc   :  { %136 = vmatmul.mubr.msk.bf16.vlgmr.msra.gmra.mrb[0].mxu0 %vm59_vm0, %v143_v11 }
  0x82   :  { %v42_v13 = vpop.permute.xlu1 %41 }
  0x83   :  { %v32_v14 = vpop.permute.xlu0 %31 }
  0x86   :  { %v47_v18 = vpop.permute.xlu1 %46 }
  0x87   :  { %v37_v21 = vpop.permute.xlu0 %36 }
  0xdf   :  { %v137_v15 = vpop.f32.mrb[0].mxu0 }
  0xe0   :  { %v109_v16 = vadd.f32 %v137_v15, %v42_v13  ;;  %v100_v17 = vpop.f32.mrb[1].mxu0 }
  0xe1   :  { %v101_v19 = vadd.f32 %v100_v17, %v32_v14  ;;  %v138_v20 = vpop.f32.mrb[2].mxu0 }
  0xe2   :  { %117 = vst [vmem:[%s212_s3 + $0x10] sm:$0xff] %v109_v16  ;;  %v112_v22 = vadd.f32 %v138_v20, %v47_v18  ;;  %v103_v23 = vpop.f32.mrb[3].mxu0 }
  0xe3   :  { %115 = vst [vmem:[%s212_s3] sm:$0xff] %v101_v19  ;;  %v104_v24 = vadd.f32 %v103_v23, %v37_v21 }
  0xe4   :  { %118 = vst [vmem:[%s212_s3 + $0x18] sm:$0xff] %v112_v22 }
  0xe5   :  { %116 = vst [vmem:[%s212_s3 + $0x8] sm:$0xff] %v104_v24 }

// kernel: forward.7
= control target key start
LH: loop header
LB: loop body
LE: loop exit
PB: predicated region body
PF: predicated region fallthrough
CT: control target
= control target key end

     0   :  { %s1060_s24 = smov 0   ;;  %s1062_s25 = smov 0   ;;  %s1233_s0 = inlined_call_operand.vmem [shape: f32[1,256], index: 0, kind: input, shape index: {}]   ;;  %s1234_s1 = inlined_call_operand.vmem [shape: f32[64,1], index: 1, kind: input, shape index: {}]   ;;  %s1235_s2 = inlined_call_operand.vmem [shape: f32[32,256], index: 2, kind: input, shape index: {}]   ;;  %s1236_s3 = inlined_call_operand.vmem [shape: bf16[32,64], index: 3, kind: input, shape index: {}]   ;;  %s1237_s4 = inlined_call_operand.vmem [shape: f32[32,1], index: 4, kind: input, shape index: {}]   ;;  %s1238_s5 = inlined_call_operand.vmem [shape: bf16[32,32], index: 5, kind: input, shape index: {}]   ;;  %s1239_s6 = inlined_call_operand.vmem [shape: f32[32,1], index: 6, kind: input, shape index: {}]   ;;  %s1240_s7 = inlined_call_operand.vmem [shape: f32[32,256], index: 7, kind: output, shape index: {}]  }
   0x1   :  { %s1064_s26 = smov 0  }
   0x2 LB: > { %s1076_s27 = sadd.s32 4294967295, %s1011_s26   ;;  %s1079_s28 = sadd.s32 1, %s1011_s26   ;;  %s1011_s26 = sphi %s1064_s26, %s1244_s26   ;;  %s1007_s25 = sphi %s1062_s25, %s1243_s25   ;;  %s1003_s24 = sphi %s1060_s24, %s1242_s24  }
   0x3   : > { %s68_s29 = ssub.s32 %s1011_s26, %s1079_s28  ;;  %s71_s30 = sadd.s32 1, %s1007_s25 }
   0x4   : > { %p69_p0 = scmp.eq.s32.totalorder %s68_s29, 0  ;;  %p78_p1 = scmp.ne.s32.totalorder %s1007_s25, %s1003_s24 }
   0x5   : > { %p79_p2 = scmp.eq.s32.totalorder %s1011_s26, 0  ;;  %p192_p3 = scmp.eq.s32.totalorder %s1076_s27, 1 }
   0x6   : > { %s1089_s8 = scalar_select %p69_p0, %s1007_s25, %s71_s30  }
   0x7   : > { %p80_p4 = por %p79_p2, %p78_p1  ;;  %p1091_p5 = por %p192_p3, %p78_p1 }
   0x8   : > { %p876_p6 = scmp.ge.s32.totalorder %s1011_s26, 2 }
   0xa   : > { %229 = sbr.rel (%p876_p6) target bundleno = 24 (0x18), region = 36 }
  0x11   : > { %238 = sbr.rel (!%p80_p4) target bundleno = 24 (0x18), region = 44  ;;  %s240_s10 = sand.u32 (%p80_p4), 1, %s1007_s25  }
  0x12   : > { %s878_s11 = sshll.u32 (%p80_p4), %s1011_s26, 3  ;;  %s877_s12 = sshll.u32 (%p80_p4), %s240_s10, 5 }
  0x13   : > { %s244_s15 = scalar_lea.vmem (%p80_p4), %s1235_s2, %s878_s11  ;;  %s242_s16 = scalar_lea.vmem (%p80_p4), [#allocation2], %s877_s12 }
  0x14   : > { %v278_v0 = vld [vmem:[%s244_s15] sm:$0xff] (%p80_p4)  ;;  %v280_v1 = vld [vmem:[%s244_s15 + $0x10] sm:$0xff] (%p80_p4) }
  0x15   : > { %v282_v2 = vld [vmem:[%s244_s15 + $0x20] sm:$0xff] (%p80_p4)  ;;  %279 = vst [vmem:[%s242_s16] sm:$0xff] (%p80_p4), %v278_v0  ;;  %281 = vst [vmem:[%s242_s16 + $0x8] sm:$0xff] (%p80_p4), %v280_v1  ;;  %v284_v3 = vld [vmem:[%s244_s15 + $0x30] sm:$0xff] (%p80_p4) }
  0x16   : > { %283 = vst [vmem:[%s242_s16 + $0x10] sm:$0xff] (%p80_p4), %v282_v2  ;;  %285 = vst [vmem:[%s242_s16 + $0x18] sm:$0xff] (%p80_p4), %v284_v3 }
  0x18 PF: > { %p879_p7 = scmp.ge.s32.totalorder %s1011_s26, 1  ;;  %p290_p8 = scmp.lt.s32.totalorder %s1011_s26, 3 }
  0x1a   : > { %p291_p9 = pnand %p879_p7, %p290_p8 }
  0x1b   : > { %v337_v4 = vld [vmem:[%s1234_s1 + $0x10] sm:$0xff] (!%p291_p9)  ;;  %v335_v5 = vld [vmem:[%s1234_s1] sm:$0xff] (!%p291_p9)  ;;  %v1013_v6 = vmov (!%p291_p9), 0   ;;  %v338_v7 = vld [vmem:[%s1234_s1 + $0x18] sm:$0xff] (!%p291_p9)  ;;  %vm471_vm0 = vcmask (!%p291_p9), 523264   ;;  %p330_p10 = scmp.lt.s32.totalorder (!%p291_p9), %s1076_s27, 1  ;;  %v344_v22 = vlaneseq (!%p291_p9) }
  0x1c   : > { %294 = sbr.rel (%p291_p9) target bundleno = 658 (0x292), region = 82  ;;  %964 = vset.pattern.permute.xlu1 (!%p291_p9), %v1013_v6  ;;  %963 = vset.pattern.permute.xlu0 (!%p291_p9), %v1013_v6  ;;  %v336_v8 = vld [vmem:[%s1234_s1 + $0x8] sm:$0xff] (!%p291_p9)  ;;  %v339_v10 = vld [vmem:[%s1234_s1 + $0x20] sm:$0xff] (!%p291_p9)  ;;  %v342_v11 = vld [vmem:[%s1234_s1 + $0x38] sm:$0xff] (!%p291_p9)  ;;  %vm571_vm1 = vcmask (!%p291_p9), 261120   ;;  %s297_s10 = sand.u32 (!%p291_p9), 1, %s1003_s24  }
  0x1d   : > { %361 = vperm.xlu1 (!%p291_p9), %964, %v337_v4   ;;  %351 = vperm.xlu0 (!%p291_p9), %963, %v335_v5   ;;  %v340_v9 = vld [vmem:[%s1234_s1 + $0x28] sm:$0xff] (!%p291_p9)  ;;  %v341_v12 = vld [vmem:[%s1234_s1 + $0x30] sm:$0xff] (!%p291_p9)  ;;  %v437_v14 = vld [vmem:[%s1237_s4] sm:$0xff] (!%p291_p9)  ;;  %v1157_v23 = vshrl.u32 (!%p291_p9), %v344_v22, 7  ;;  %s880_s11 = sshll.u32 (!%p291_p9), %s297_s10, 5 }
  0x1e   : > { %v438_v13 = vld [vmem:[%s1237_s4 + $0x8] sm:$0xff] (!%p291_p9)  ;;  %v440_v15 = vld [vmem:[%s1237_s4 + $0x18] sm:$0xff] (!%p291_p9)  ;;  %v439_v16 = vld [vmem:[%s1237_s4 + $0x10] sm:$0xff] (!%p291_p9)  ;;  %s299_s12 = scalar_lea.vmem (!%p291_p9), [#allocation2], %s880_s11  ;;  %s329_s24 = scalar_lea.vmem (!%p291_p9), [#allocation3], %s880_s11 }
  0x1f   : > { %v538_v17 = vld [vmem:[%s1239_s6 + $0x8] sm:$0xff] (!%p291_p9)  ;;  %v537_v18 = vld [vmem:[%s1239_s6] sm:$0xff] (!%p291_p9)  ;;  %v540_v19 = vld [vmem:[%s1239_s6 + $0x18] sm:$0xff] (!%p291_p9)  ;;  %v346_v24 = vsub.s32 (!%p291_p9), 0, %v1157_v23 }
  0x20   : > { %v539_v20 = vld [vmem:[%s1239_s6 + $0x10] sm:$0xff] (!%p291_p9)  ;;  %v965_v21 = vld [vmem:[%s1236_s3] sm:$0xff] (!%p291_p9)   ;;  %v734_v23 = vld [vmem:[%s299_s12 + $0x8] sm:$0xff] (!%p291_p9) }
  0x21   : > { %366 = vperm.xlu1 (!%p291_p9), %964, %v338_v7   ;;  %356 = vperm.xlu0 (!%p291_p9), %963, %v336_v8  }
  0x22   : > { %916 = vmatprep.mubr.msk.bf16.mxu0 (!%p291_p9), %vm471_vm0, %v965_v21 }
  0x23   : > { %s331_s17 = scalar_select %p330_p10, %s1076_s27, 1 }
  0x24   : > { %s895_s13 = sshll.u32 (%p1091_p5), %s1076_s27, 3 }
  0x25   : > { %376 = vperm.xlu1 %964, %v340_v9   ;;  %371 = vperm.xlu0 %963, %v339_v10   ;;  %s332_s20 = scalar_lea.vmem %s1233_s0, %s331_s17  ;;  %s763_s16 = scalar_lea.vmem (%p1091_p5), %s1240_s7, %s895_s13 }
  0x26   : > { %v1163_v25 = vld [vmem:[%s332_s20] sm:$0x1] }
  0x27   : > { %v347_v26 = vrot.slane %v1163_v25, %v346_v24 }
  0x29   : > { %386 = vperm.xlu1 %964, %v342_v11   ;;  %381 = vperm.xlu0 %963, %v341_v12  }
  0x2d   : > { %448 = vperm.xlu1 %964, %v438_v13   ;;  %443 = vperm.xlu0 %963, %v437_v14  }
  0x31   : > { %458 = vperm.xlu1 %964, %v440_v15   ;;  %453 = vperm.xlu0 %963, %v439_v16   ;;  %v966_v15 = vld [vmem:[%s1236_s3 + $0x8] sm:$0xff]   ;;  %v967_v16 = vld [vmem:[%s1238_s5] sm:$0xff]  }
  0x32   : > { %924 = vmatprep.mubr.msk.bf16.mxu1 %vm571_vm1, %v967_v16 }
  0x35   : > { %548 = vperm.xlu1 %964, %v538_v17   ;;  %543 = vperm.xlu0 %963, %v537_v18  }
  0x39   : > { %558 = vperm.xlu1 %964, %v540_v19   ;;  %553 = vperm.xlu0 %963, %v539_v20  }
  0x9c   : > { %v362_v27 = vpop.permute.xlu1 %361  ;;  %v352_v28 = vpop.permute.xlu0 %351 }
  0x9d   : > { %v391_v29 = vsub.f32 %v347_v26, %v362_v27  ;;  %v389_v30 = vsub.f32 %v347_v26, %v352_v28 }
  0x9f   : > { %v397_v31 = vmul.f32 -48.019997, %v389_v30  ;;  %v399_v32 = vmul.f32 -48.019997, %v391_v29 }
  0xa0   : > { %v367_v33 = vpop.permute.xlu1 %366  ;;  %v357_v34 = vpop.permute.xlu0 %356 }
  0xa1   : > { %v405_v35 = vmul.f32 %v397_v31, %v389_v30  ;;  %v392_v36 = vsub.f32 %v347_v26, %v367_v33  ;;  %v390_v37 = vsub.f32 %v347_v26, %v357_v34  ;;  %v407_v39 = vmul.f32 %v399_v32, %v391_v29 }
  0xa3   : > { %v400_v38 = vmul.f32 -48.019997, %v392_v36  ;;  %v413_v40 = vmul.f32 1.442695, %v405_v35  ;;  %v398_v41 = vmul.f32 -48.019997, %v390_v37 }
  0xa4   : > { %v377_v42 = vpop.permute.xlu1 %376  ;;  %v372_v43 = vpop.permute.xlu0 %371  ;;  %v417_v51 = vmul.f32 1.442695, %v407_v39  ;;  %v1181_v39 = vmul.f32 0.62831855, %v1163_v25 }
  0xa5   : > { %v408_v44 = vmul.f32 %v400_v38, %v392_v36  ;;  %v394_v45 = vsub.f32 %v347_v26, %v377_v42  ;;  %v393_v46 = vsub.f32 %v347_v26, %v372_v43  ;;  %v406_v47 = vmul.f32 %v398_v41, %v390_v37  ;;  %v968_v38 = vld [vmem:[%s1238_s5 + $0x8] sm:$0xff]  }
  0xa6   : > { %969 = vpow2.f32 %v413_v40  ;;  %v631_v40 = vand.u32 2139095040, %v1181_v39  ;;  %vm630_vm9 = vcmp.lt.s32.totalorder %v1181_v39, 0  ;;  %vm720_vm14 = vweird.f32 %v1181_v39 }
  0xa7   : > { %v419_v48 = vmul.f32 1.442695, %v408_v44  ;;  %v402_v49 = vmul.f32 -48.019997, %v394_v45  ;;  %v401_v50 = vmul.f32 -48.019997, %v393_v46 }
  0xa8   : > { %v415_v52 = vmul.f32 1.442695, %v406_v47  ;;  %v387_v53 = vpop.permute.xlu1 %386  ;;  %v382_v54 = vpop.permute.xlu0 %381  ;;  %v632_v41 = vshrl.u32 %v631_v40, 23  ;;  %v1014_v47 = vmov 2102212464  }
  0xa9   : > { %971 = vpow2.f32 %v419_v48  ;;  %v410_v55 = vmul.f32 %v402_v49, %v394_v45  ;;  %v409_v56 = vmul.f32 %v401_v50, %v393_v46  ;;  %v396_v57 = vsub.f32 %v347_v26, %v387_v53 }
  0xaa   : > { %973 = vpow2.f32 %v415_v52  ;;  %v395_v58 = vsub.f32 %v347_v26, %v382_v54  ;;  %v890_v42 = vadd.s32 4294967169, %v632_v41  ;;  %v1015_v49 = vmov 920167782  }
  0xab   : > { %v423_v59 = vmul.f32 1.442695, %v410_v55  ;;  %v421_v60 = vmul.f32 1.442695, %v409_v56  ;;  %v404_v61 = vmul.f32 -48.019997, %v396_v57  ;;  %975 = vpow2.f32 %v417_v51 }
  0xac   : > { %v403_v62 = vmul.f32 -48.019997, %v395_v58  ;;  %v444_v17 = vpop.permute.xlu0 %443  ;;  %v449_v18 = vpop.permute.xlu1 %448  ;;  %v638_v43 = vadd.s32 1, %v890_v42  ;;  %v628_v51 = vand.u32 2147483647, %v1181_v39 }
  0xad   : > { %977 = vpow2.f32 %v423_v59  ;;  %v412_v63 = vmul.f32 %v404_v61, %v396_v57  ;;  %v1016_v54 = vmov 1326507024   ;;  %v1017_v55 = vmov 683565275  }
  0xae   : > { %979 = vpow2.f32 %v421_v60  ;;  %v411_v0 = vmul.f32 %v403_v62, %v395_v58  ;;  %vm639_vm2 = vcmp.gt.s32.totalorder %v638_v43, 0  ;;  %v1018_v57 = vmov 2475754826  }
  0xaf   : > { %v427_v1 = vmul.f32 1.442695, %v412_v63  ;;  %v640_v44 = vsel %vm639_vm2, %v638_v43, 0  ;;  %v1019_v60 = vmov 2131351028  }
  0xb0   : > { %v425_v2 = vmul.f32 1.442695, %v411_v0  ;;  %v970_v3 = vpop.eup %969  ;;  %v454_v19 = vpop.permute.xlu0 %453  ;;  %v642_v45 = vand.u32 31, %v640_v44  ;;  %v641_v52 = vshrl.u32 %v640_v44, 5  ;;  %vm629_vm10 = vcmp.le.f32.partialorder %v628_v51, 0.7853982 }
  0xb1   : > { %981 = vpow2.f32 %v427_v1  ;;  %v459_v26 = vpop.permute.xlu1 %458  ;;  %v635_v1 = vand.u32 8388607, %v628_v51 }
  0xb2   : > { %983 = vpow2.f32 %v425_v2  ;;  %v643_v46 = vsub.s32 32, %v642_v45  ;;  %v654_v48 = vshll.u32 %v1014_v47, %v642_v45  ;;  %v657_v53 = vshll.u32 %v1015_v49, %v642_v45 }
  0xb3   : > { %v972_v4 = vpop.eup %971  ;;  %v645_v56 = vshll.u32 %v1017_v55, %v642_v45  ;;  %v648_v59 = vshll.u32 %v1018_v57, %v642_v45  ;;  %v651_v62 = vshll.u32 %v1019_v60, %v642_v45  ;;  %vm663_vm3 = vcmp.lt.s32.totalorder %v641_v52, 4 }
  0xb4   : > { %v974_v5 = vpop.eup %973  ;;  %v655_v50 = vshrl.u32 %v1015_v49, %v643_v46  ;;  %v658_v25 = vshrl.u32 %v1016_v54, %v643_v46  ;;  %v646_v58 = vshrl.u32 %v1018_v57, %v643_v46  ;;  %v649_v61 = vshrl.u32 %v1019_v60, %v643_v46 }
  0xb5   : > { %v433_v6 = vpack.c.bf16 %v974_v5, %v970_v3  ;;  %v976_v7 = vpop.eup %975  ;;  %v652_v63 = vshrl.u32 %v1014_v47, %v643_v46  ;;  %vm660_vm4 = vcmp.lt.s32.totalorder %v641_v52, 1  ;;  %vm662_vm5 = vcmp.lt.s32.totalorder %v641_v52, 3 }
  0xb6   : > { %v434_v9 = vpack.c.bf16 %v972_v4, %v976_v7  ;;  %v656_v0 = vor.u32 %v655_v50, %v654_v48  ;;  %v659_v2 = vor.u32 %v658_v25, %v657_v53  ;;  %v647_v3 = vor.u32 %v646_v58, %v645_v56 }
  0xb7   : > { %v978_v8 = vpop.eup %977  ;;  %908 = vmatprep.subr.bf16.mxu0 %v433_v6  ;;  %v650_v4 = vor.u32 %v649_v61, %v648_v59  ;;  %v653_v5 = vor.u32 %v652_v63, %v651_v62  ;;  %v636_v7 = vor.u32 8388608, %v635_v1  ;;  %vm661_vm6 = vcmp.lt.s32.totalorder %v641_v52, 2 }
  0xb8   : > { %v980_v10 = vpop.eup %979  ;;  %909 = vmatpush3.bf16.msra.mxu0 %v433_v6  ;;  %v669_v6 = vsel %vm663_vm3, %v656_v0, 920167782 }
  0xb9   : > { %910 = vmatprep.subr.bf16.mxu0 %v434_v9  ;;  %v435_v12 = vpack.c.bf16 %v978_v8, %v980_v10  ;;  %v673_v8 = vsel %vm663_vm3, %v659_v2, 1326507024  ;;  %v670_v10 = vsel %vm662_vm5, %v653_v5, %v669_v6 }
  0xbb   : > { %v982_v11 = vpop.eup %981 }
  0xbc   : > { %v984_v13 = vpop.eup %983  ;;  %911 = vmatpush3.bf16.msra.mxu0 %v434_v9  ;;  %v668_v9 = vsel %vm660_vm4, %v647_v3, %v650_v4 }
  0xbd   : > { %912 = vmatprep.subr.bf16.mxu0 %v435_v12  ;;  %v436_v14 = vpack.c.bf16 %v982_v11, %v984_v13  ;;  %v672_v11 = vsel %vm660_vm4, %v650_v4, %v653_v5  ;;  %v676_v13 = vshll.u32 %v636_v7, 8  ;;  %v549_v7 = vpop.permute.xlu1 %548 }
  0xc0   : > { %913 = vmatpush3.bf16.msra.mxu0 %v435_v12  ;;  %v674_v12 = vsel %vm662_vm5, %v656_v0, %v673_v8 }
  0xc1   : > { %914 = vmatprep.subr.bf16.mxu0 %v436_v14 }
  0xc4   : > { %915 = vmatpush3.bf16.msra.mxu0 %v436_v14  ;;  %v671_v14 = vsel %vm661_vm6, %v668_v9, %v670_v10 }
  0xc7   : > { %917 = vmatmul.mubr.msk.bf16.vlgmr.msra.gmra.mrb[0].mxu0 %vm471_vm0, %v966_v15  ;;  %v675_v15 = vsel %vm661_vm6, %v672_v11, %v674_v12 }
 0x19a   : > { %v918_v20 = vpop.f32.mrb[0].mxu0 }
 0x19b   : > { %v521_v21 = vadd.f32 %v918_v20, %v454_v19  ;;  %v512_v22 = vpop.f32.mrb[1].mxu0  ;;  %v1198_v19 = vmul.u32.u64.low %v676_v13, %v675_v15  ;;  %v1199_v20 = vmul.u32.u64.high %v676_v13, %v675_v15, %v1198_v19 }
 0x19c   : > { %v513_v27 = vadd.f32 %v512_v22, %v444_v17  ;;  %v919_v28 = vpop.f32.mrb[2].mxu0  ;;  %v1195_v16 = vmul.u32.u64.low %v676_v13, %v671_v14  ;;  %v1196_v17 = vmul.u32.u64.high %v676_v13, %v671_v14, %v1195_v16  ;;  %v735_v14 = vld [vmem:[%s299_s12 + $0x10] sm:$0xff] }
 0x19d   : > { %v524_v29 = vadd.f32 %v919_v28, %v459_v26  ;;  %v515_v30 = vpop.f32.mrb[3].mxu0  ;;  %v529_v32 = vmax.f32 %v521_v21, 0.0  ;;  %v665_v21 = vsel %vm663_vm3, %v653_v5, 2102212464  ;;  %v544_v5 = vpop.permute.xlu0 %543 }
 0x19e   : > { %v516_v31 = vadd.f32 %v515_v30, %v449_v18  ;;  %v527_v34 = vmax.f32 %v513_v27, 0.0  ;;  %v644_v18 = vshrl.u32 %v1017_v55, %v643_v46  ;;  %v666_v26 = vsel %vm662_vm5, %v650_v4, %v665_v21  ;;  %v736_v21 = vld [vmem:[%s299_s12 + $0x18] sm:$0xff] }
 0x19f   : > { %v530_v33 = vmax.f32 %v524_v29, 0.0  ;;  %v686_v28 = vadd.s32 1, %v1196_v17  ;;  %vm685_vm7 = vc.u32 %v1199_v20, %v1195_v16  ;;  %v684_v43 = vadd.s32 %v1195_v16, %v1199_v20 }
 0x1a0   : > { %v528_v35 = vmax.f32 %v516_v31, 0.0  ;;  %v664_v22 = vsel %vm660_vm4, %v644_v18, %v647_v3 }
 0x1a1   : > { %v536_v36 = vpack.c.bf16 %v530_v33, %v529_v32  ;;  %v667_v27 = vsel %vm661_vm6, %v664_v22, %v666_v26  ;;  %v687_v30 = vsel %vm685_vm7, %v686_v28, %v1196_v17  ;;  %v554_v9 = vpop.permute.xlu0 %553  ;;  %v733_v17 = vld [vmem:[%s299_s12] sm:$0xff] }
 0x1a2   : > { %v535_v37 = vpack.c.bf16 %v528_v35, %v527_v34  ;;  %v683_v29 = vmul.u32 %v676_v13, %v667_v27  ;;  %v559_v13 = vpop.permute.xlu1 %558 }
 0x1a4   : > { %920 = vmatprep.subr.bf16.mxu1 %v535_v37  ;;  %v688_v31 = vadd.s32 %v687_v30, %v683_v29 }
 0x1a5   : > { %921 = vmatpush3.bf16.msra.mxu1 %v535_v37 }
 0x1a6   : > { %922 = vmatprep.subr.bf16.mxu1 %v536_v36  ;;  %v689_v32 = vadd.s32 536870912, %v688_v31 }
 0x1a8   : > { %v690_v33 = vshrl.u32 %v689_v32, 30 }
 0x1a9   : > { %923 = vmatpush3.bf16.msra.mxu1 %v536_v36 }
 0x1aa   : > { %v691_v34 = vshll.u32 %v690_v33, 30  ;;  %v714_v57 = vsub.s32 4, %v690_v33 }
 0x1ac   : > { %925 = vmatmul.mubr.msk.bf16.vlgmr.msra.gmra.mrb[0].mxu1 %vm571_vm1, %v968_v38  ;;  %v692_v35 = vsub.s32 %v688_v31, %v691_v34  ;;  %v715_v58 = vsel %vm630_vm9, %v714_v57, %v690_v33 }
 0x1ad   : > { %v717_v59 = vsel %vm629_vm10, 0, %v715_v58 }
 0x1ae   : > { %v694_v36 = vsub.s32 0, %v692_v35  ;;  %v721_v62 = vand.u32 3, %v717_v59 }
 0x1b0   : > { %v891_v37 = vmin.u32 %v694_v36, %v692_v35  ;;  %vm723_vm11 = vcmp.eq.s32.totalorder %v721_v62, 0  ;;  %vm726_vm12 = vcmp.eq.s32.totalorder %v721_v62, 2  ;;  %vm722_vm13 = vcmp.lt.s32.totalorder %v721_v62, 2 }
 0x1b2   : > { %v696_v38 = vclz %v891_v37 }
 0x1b4   : > { %v892_v40 = vadd.s32 4294967294, %v696_v38 }
 0x1b6   : > { %vm893_vm8 = vcmp.lt.s32.totalorder %v892_v40, 0 }
 0x1b7   : > { %v699_v41 = vsel %vm893_vm8, 0, %v892_v40 }
 0x1b8   : > { %v704_v42 = vsub.s32 4294967266, %v699_v41  ;;  %v700_v44 = vsub.s32 32, %v699_v41  ;;  %v701_v46 = vshll.u32 %v692_v35, %v699_v41 }
 0x1ba   : > { %v705_v45 = vadd.s32 127, %v704_v42  ;;  %v702_v47 = vshrl.u32 %v684_v43, %v700_v44 }
 0x1bc   : > { %v706_v48 = vshll.u32 %v705_v45, 23  ;;  %v703_v49 = vor.u32 %v702_v47, %v701_v46 }
 0x1be   : > { %v707_v50 = vor.u32 4788187, %v706_v48  ;;  %v710_v53 = vcvt.s32.f32 %v703_v49 }
 0x1c0   : > { %v708_v52 = vand.u32 2147483647, %v707_v50 }
 0x1c2   : > { %v711_v54 = vmul.f32 %v710_v53, %v708_v52 }
 0x1c4   : > { %v712_v25 = vxor.u32 2147483648, %v711_v54 }
 0x1c6   : > { %v713_v55 = vsel %vm630_vm9, %v712_v25, %v711_v54 }
 0x1c7   : > { %v716_v56 = vsel %vm629_vm10, %v1181_v39, %v713_v55 }
 0x1c8   : > { %985 = vcosq.f32 %v716_v56 }
 0x1c9   : > { %987 = vsinq.f32 %v716_v56 }
 0x1d2   : > { %v986_v60 = vpop.eup %985 }
 0x1d3   : > { %v988_v61 = vpop.eup %987  ;;  %v727_v0 = vxor.u32 2147483648, %v986_v60 }
 0x1d4   : > { %v724_v63 = vxor.u32 2147483648, %v988_v61 }
 0x1d5   : > { %v728_v2 = vsel %vm726_vm12, %v727_v0, %v988_v61 }
 0x1d6   : > { %v725_v1 = vsel %vm723_vm11, %v986_v60, %v724_v63 }
 0x1d7   : > { %v729_v51 = vsel %vm722_vm13, %v725_v1, %v728_v2 }
 0x1d8   : > { %v730_v3 = vsel %vm720_vm14, nan, %v729_v51 }
 0x1d9   : > { %v731_v4 = vadd.f32 1.0, %v730_v3 }
 0x1db   : > { %v732_v6 = vmul.f32 0.5, %v731_v4 }
 0x1dd   : > { %v741_v8 = vrot.slane %v732_v6, %v346_v24 }
 0x27f   : > { %v926_v10 = vpop.f32.mrb[0].mxu1 }
 0x280   : > { %v621_v11 = vadd.f32 %v926_v10, %v554_v9  ;;  %v612_v12 = vpop.f32.mrb[1].mxu1 }
 0x281   : > { %v613_v15 = vadd.f32 %v612_v12, %v544_v5  ;;  %v927_v39 = vpop.f32.mrb[2].mxu1 }
 0x282   : > { %v745_v16 = vmul.f32 %v741_v8, %v621_v11  ;;  %v624_v18 = vadd.f32 %v927_v39, %v559_v13  ;;  %v615_v19 = vpop.f32.mrb[3].mxu1 }
 0x283   : > { %v743_v20 = vmul.f32 %v741_v8, %v613_v15  ;;  %v616_v22 = vadd.f32 %v615_v19, %v549_v7  ;;  %761 = sbr.rel (!%p1091_p5) target bundleno = 658 (0x292), region = 90 }
 0x284   : > { %v749_v26 = vmul.f32 %v745_v16, %v735_v14  ;;  %v746_v27 = vmul.f32 %v741_v8, %v624_v18 }
 0x285   : > { %v747_v24 = vmul.f32 %v743_v20, %v733_v17  ;;  %v744_v28 = vmul.f32 %v741_v8, %v616_v22 }
 0x286   : > { %753 = vst [vmem:[%s329_s24 + $0x10] sm:$0xff] %v749_v26  ;;  %v750_v29 = vmul.f32 %v746_v27, %v736_v21 }
 0x287   : > { %751 = vst [vmem:[%s329_s24] sm:$0xff] %v747_v24  ;;  %v748_v30 = vmul.f32 %v744_v28, %v734_v23 }
 0x288   : > { %754 = vst [vmem:[%s329_s24 + $0x18] sm:$0xff] %v750_v29 }
 0x289   : > { %752 = vst [vmem:[%s329_s24 + $0x8] sm:$0xff] %v748_v30 }
 0x28d   : > { %v801_v33 = vld [vmem:[%s329_s24 + $0x10] sm:$0xff] }
 0x28e   : > { %v797_v31 = vld [vmem:[%s329_s24] sm:$0xff]  ;;  %802 = vst [vmem:[%s763_s16 + $0x20] sm:$0xff] %v801_v33 }
 0x28f   : > { %v803_v34 = vld [vmem:[%s329_s24 + $0x18] sm:$0xff]  ;;  %798 = vst [vmem:[%s763_s16] sm:$0xff] %v797_v31 }
 0x290   : > { %v799_v32 = vld [vmem:[%s329_s24 + $0x8] sm:$0xff]  ;;  %804 = vst [vmem:[%s763_s16 + $0x30] sm:$0xff] %v803_v34 }
 0x291   : > { %800 = vst [vmem:[%s763_s16 + $0x10] sm:$0xff] %v799_v32 }
 0x292 PF: > { %p14_p11 = scmp.ge.s32.totalorder %s1079_s28, 4   ;;  %s1242_s24 = smov %s1007_s25 }
 0x293   : > { %s1243_s25 = smov %s1089_s8  ;;  %s1244_s26 = smov %s1079_s28 }
 0x294   :  { %16 = sbr.rel (!%p14_p11) target bundleno = 2 (0x2), region = 162 }

// kernel: forward.8
= control target key start
LH: loop header
LB: loop body
LE: loop exit
PB: predicated region body
PF: predicated region fallthrough
CT: control target
= control target key end

     0   :  { %v278_v3 = vmov 0   ;;  %vm72_vm0 = vcmask 261120   ;;  %s390_s0 = inlined_call_operand.vmem [shape: f32[32,128], index: 0, kind: input, shape index: {}]   ;;  %s391_s2 = inlined_call_operand.vmem [shape: bf16[32,32], index: 2, kind: input, shape index: {}]   ;;  %s392_s3 = inlined_call_operand.vmem [shape: f32[32,1], index: 3, kind: input, shape index: {}]   ;;  %s393_s5 = inlined_call_operand.vmem [shape: f32[32,1], index: 5, kind: input, shape index: {}]   ;;  %s394_s4 = inlined_call_operand.vmem [shape: bf16[32,32], index: 4, kind: input, shape index: {}]   ;;  %s395_s1 = inlined_call_operand.vmem [shape: f32[32,128], index: 1, kind: input, shape index: {}]   ;;  %s396_s6 = inlined_call_operand.vmem [shape: f32[32,128], index: 6, kind: output, shape index: {}]  }
   0x1   :  { %v28_v0 = vld [vmem:[%s390_s0] sm:$0xff]  ;;  %v29_v1 = vld [vmem:[%s390_s0 + $0x8] sm:$0xff]  ;;  %v30_v2 = vld [vmem:[%s390_s0 + $0x10] sm:$0xff]  ;;  %272 = vset.pattern.permute.xlu0 %v278_v3  ;;  %273 = vset.pattern.permute.xlu1 %v278_v3 }
   0x2   :  { %v36_v4 = vpack.c.bf16 %v29_v1, %v28_v0  ;;  %v31_v5 = vld [vmem:[%s390_s0 + $0x18] sm:$0xff]  ;;  %v274_v7 = vld [vmem:[%s391_s2] sm:$0xff]   ;;  %v40_v9 = vld [vmem:[%s392_s3 + $0x10] sm:$0xff] }
   0x3   :  { %v37_v6 = vpack.c.bf16 %v31_v5, %v30_v2  ;;  %v38_v8 = vld [vmem:[%s392_s3] sm:$0xff]  ;;  %259 = vmatprep.mubr.msk.bf16.mxu0 %vm72_vm0, %v274_v7  ;;  %54 = vperm.xlu1 %273, %v40_v9   ;;  %v39_v10 = vld [vmem:[%s392_s3 + $0x8] sm:$0xff]  ;;  %v41_v12 = vld [vmem:[%s392_s3 + $0x18] sm:$0xff] }
   0x4   :  { %255 = vmatprep.subr.bf16.mxu0 %v36_v4  ;;  %44 = vperm.xlu0 %272, %v38_v8   ;;  %v275_v11 = vld [vmem:[%s391_s2 + $0x8] sm:$0xff]   ;;  %v138_v13 = vld [vmem:[%s393_s5] sm:$0xff]  ;;  %v140_v15 = vld [vmem:[%s393_s5 + $0x10] sm:$0xff] }
   0x5   :  { %256 = vmatpush3.bf16.msra.mxu0 %v36_v4  ;;  %v139_v14 = vld [vmem:[%s393_s5 + $0x8] sm:$0xff]  ;;  %v141_v16 = vld [vmem:[%s393_s5 + $0x18] sm:$0xff]  ;;  %v276_v17 = vld [vmem:[%s394_s4] sm:$0xff]  }
   0x6   :  { %257 = vmatprep.subr.bf16.mxu0 %v37_v6  ;;  %267 = vmatprep.mubr.msk.bf16.mxu1 %vm72_vm0, %v276_v17  ;;  %v277_v36 = vld [vmem:[%s394_s4 + $0x8] sm:$0xff]   ;;  %v26_v40 = vld [vmem:[%s395_s1 + $0x10] sm:$0xff]  ;;  %v24_v43 = vld [vmem:[%s395_s1] sm:$0xff] }
   0x7   :  { %59 = vperm.xlu1 %273, %v41_v12   ;;  %v27_v47 = vld [vmem:[%s395_s1 + $0x18] sm:$0xff]  ;;  %v25_v51 = vld [vmem:[%s395_s1 + $0x8] sm:$0xff] }
   0x8   :  { %49 = vperm.xlu0 %272, %v39_v10  }
   0x9   :  { %258 = vmatpush3.bf16.msra.mxu0 %v37_v6 }
   0xb   :  { %149 = vperm.xlu1 %273, %v139_v14  }
   0xc   :  { %260 = vmatmul.mubr.msk.bf16.vlgmr.msra.gmra.mrb[0].mxu0 %vm72_vm0, %v275_v11  ;;  %144 = vperm.xlu0 %272, %v138_v13  }
   0xf   :  { %159 = vperm.xlu1 %273, %v141_v16  }
  0x10   :  { %154 = vperm.xlu0 %272, %v140_v15  }
  0x82   :  { %v55_v18 = vpop.permute.xlu1 %54 }
  0x83   :  { %v45_v19 = vpop.permute.xlu0 %44 }
  0x86   :  { %v60_v23 = vpop.permute.xlu1 %59 }
  0x87   :  { %v50_v26 = vpop.permute.xlu0 %49 }
  0x8a   :  { %v150_v38 = vpop.permute.xlu1 %149 }
  0x8b   :  { %v145_v37 = vpop.permute.xlu0 %144 }
  0x8e   :  { %v160_v45 = vpop.permute.xlu1 %159 }
  0x8f   :  { %v155_v39 = vpop.permute.xlu0 %154 }
  0xdf   :  { %v261_v20 = vpop.f32.mrb[0].mxu0 }
  0xe0   :  { %v122_v21 = vadd.f32 %v261_v20, %v55_v18  ;;  %v113_v22 = vpop.f32.mrb[1].mxu0 }
  0xe1   :  { %v114_v24 = vadd.f32 %v113_v22, %v45_v19  ;;  %v262_v25 = vpop.f32.mrb[2].mxu0 }
  0xe2   :  { %v125_v27 = vadd.f32 %v262_v25, %v60_v23  ;;  %v116_v28 = vpop.f32.mrb[3].mxu0  ;;  %v130_v30 = vmax.f32 %v122_v21, 0.0 }
  0xe3   :  { %v117_v29 = vadd.f32 %v116_v28, %v50_v26  ;;  %v128_v32 = vmax.f32 %v114_v24, 0.0 }
  0xe4   :  { %v131_v31 = vmax.f32 %v125_v27, 0.0 }
  0xe5   :  { %v129_v33 = vmax.f32 %v117_v29, 0.0 }
  0xe6   :  { %v137_v34 = vpack.c.bf16 %v131_v31, %v130_v30 }
  0xe7   :  { %v136_v35 = vpack.c.bf16 %v129_v33, %v128_v32 }
  0xe9   :  { %263 = vmatprep.subr.bf16.mxu1 %v136_v35 }
  0xea   :  { %264 = vmatpush3.bf16.msra.mxu1 %v136_v35 }
  0xeb   :  { %265 = vmatprep.subr.bf16.mxu1 %v137_v34 }
  0xee   :  { %266 = vmatpush3.bf16.msra.mxu1 %v137_v34 }
  0xf1   :  { %268 = vmatmul.mubr.msk.bf16.vlgmr.msra.gmra.mrb[0].mxu1 %vm72_vm0, %v277_v36 }
 0x1c4   :  { %v269_v41 = vpop.f32.mrb[0].mxu1 }
 0x1c5   :  { %v221_v42 = vadd.f32 %v269_v41, %v155_v39  ;;  %v212_v44 = vpop.f32.mrb[1].mxu1 }
 0x1c6   :  { %v213_v46 = vadd.f32 %v212_v44, %v145_v37  ;;  %v270_v48 = vpop.f32.mrb[2].mxu1 }
 0x1c7   :  { %v229_v49 = vadd.f32 %v221_v42, %v26_v40  ;;  %v224_v50 = vadd.f32 %v270_v48, %v160_v45  ;;  %v215_v52 = vpop.f32.mrb[3].mxu1 }
 0x1c8   :  { %v227_v53 = vadd.f32 %v213_v46, %v24_v43  ;;  %v216_v54 = vadd.f32 %v215_v52, %v150_v38 }
 0x1c9   :  { %233 = vst [vmem:[%s396_s6 + $0x10] sm:$0xff] %v229_v49  ;;  %v230_v55 = vadd.f32 %v224_v50, %v27_v47 }
 0x1ca   :  { %231 = vst [vmem:[%s396_s6] sm:$0xff] %v227_v53  ;;  %v228_v56 = vadd.f32 %v216_v54, %v25_v51 }
 0x1cb   :  { %234 = vst [vmem:[%s396_s6 + $0x18] sm:$0xff] %v230_v55 }
 0x1cc   :  { %232 = vst [vmem:[%s396_s6 + $0x8] sm:$0xff] %v228_v56 }

</bundles_post_ra>
